<compile_context>
chip_gen: v5e
topology: v5e:2x2
jax: 0.10.0
libtpu: 0.0.40
codegen_flags: <defaults>
</compile_context>

<pallas_src>
import functools
import math

import numpy as np
import jax
import jax.numpy as jnp
from jax.experimental import pallas as pl
from jax.experimental.pallas import tpu as pltpu


def _round_up(x, m):
    return ((x + m - 1) // m) * m


def _lcm(a, b):
    return a * b // math.gcd(a, b)


def _pick_tile(count, unit, max_tile, min_blocks=2):
    """Largest tile <= max_tile (multiple of `unit`); split so the grid has
    >= min_blocks blocks when possible (keeps both v7x TensorCores busy)."""
    max_tile = max(unit, (max_tile // unit) * unit)
    padded = _round_up(max(count, 1), unit)
    tile = min(max_tile, padded)
    if padded // tile < min_blocks and padded >= unit * min_blocks:
        tile = _round_up((padded + min_blocks - 1) // min_blocks, unit)
    return tile


# ------------------------------ linear kernel -------------------------------

def _linear_kernel(x_ref, w_ref, b_ref, o_ref):
    o_ref[...] = (jnp.dot(x_ref[...], w_ref[...],
                          preferred_element_type=jnp.float32) + b_ref[...])


def linear_pallas(x, w, b, *, cast_bf16=True, tile_rows=1024):
    """y = x @ w + b, row-tiled.  bf16 MXU operands, f32 accumulate + f32 bias."""
    n, cin = x.shape
    cout = w.shape[1]
    op_dtype = jnp.bfloat16 if cast_bf16 else jnp.float32
    x = x.astype(op_dtype)
    w = w.astype(op_dtype)
    b = b.reshape(1, cout).astype(jnp.float32)

    tm = _pick_tile(n, 8, tile_rows)
    n_pad = _round_up(n, tm)
    if n_pad != n:
        x = jnp.pad(x, ((0, n_pad - n), (0, 0)))

    out = pl.pallas_call(
        _linear_kernel,
        out_shape=jax.ShapeDtypeStruct((n_pad, cout), jnp.float32),
        grid=(n_pad // tm,),
        in_specs=[pl.BlockSpec((tm, cin), lambda i: (i, 0)),
                  pl.BlockSpec((cin, cout), lambda i: (0, 0)),
                  pl.BlockSpec((1, cout), lambda i: (0, 0))],
        out_specs=pl.BlockSpec((tm, cout), lambda i: (i, 0)),
        compiler_params=pltpu.CompilerParams(
            dimension_semantics=("parallel",),
            vmem_limit_bytes=32 * 1024 * 1024),
    )(x, w, b)
    return out[:n]


# --------------------------- selector matrices (host) ------------------------

def _packed_head_selector(pack, heads, head_channels):
    """(pack*HD, pack*H) 0/1 matrix: packed-lane terms -> per-(pair, head) sums."""
    hd = heads * head_channels
    c = np.arange(pack * hd)
    j = np.arange(pack * heads)
    sel = ((c[:, None] // hd) == (j[None, :] // heads)) & \
          (((c[:, None] % hd) // head_channels) == (j[None, :] % heads))
    return jnp.asarray(sel.astype(np.float32), dtype=jnp.bfloat16)


def _ext_head_selector(heads, head_channels):
    """(H, HD+H): widens per-head p over the head's D lanes and copies p into the
    trailing H "denominator" columns."""
    hd = heads * head_channels
    sel = np.zeros((heads, hd + heads), np.float32)
    for h in range(heads):
        sel[h, h * head_channels:(h + 1) * head_channels] = 1.0
        sel[h, hd + h] = 1.0
    return jnp.asarray(sel, dtype=jnp.bfloat16)


# ----------------------------- cRPE logits kernel ----------------------------

def _crpe_logits_kernel(qp_ref, kp_ref, rq_ref, rk_ref, sel_ref, o_ref):
    """Per-pair cRPE logits on lane-dense packed streams.

    qp/kp: (tmp, pack*HD) f32, rq/rk: (tmp, pack*HD) bf16,
    sel:   (pack*HD, pack*H) bf16, out: (tmp, pack*H) f32.
    """
    qp = qp_ref[...]
    kp = kp_ref[...]
    rq = rq_ref[...].astype(jnp.float32)   # elementwise math in f32 (v5e: no bf16 VPU)
    rk = rk_ref[...].astype(jnp.float32)
    # q*k + q*Tq + k*Tk == q*(k+Tq) + k*Tk  (q pre-scaled in the wrapper)
    terms = qp * (kp + rq) + kp * rk
    o_ref[...] = jnp.dot(terms.astype(jnp.bfloat16), sel_ref[...],
                         preferred_element_type=jnp.float32)


def crpe_logits_pallas(qp, kp, rq, rk, sel, *, heads, pack, tile_m):
    rows, lanes = qp.shape                 # rows = m_pad // pack
    tmp = tile_m // pack
    pair_spec = pl.BlockSpec((tmp, lanes), lambda i: (i, 0))
    return pl.pallas_call(
        _crpe_logits_kernel,
        out_shape=jax.ShapeDtypeStruct((rows, pack * heads), jnp.float32),
        grid=(rows // tmp,),
        in_specs=[pair_spec, pair_spec, pair_spec, pair_spec,
                  pl.BlockSpec((lanes, pack * heads), lambda i: (0, 0))],
        out_specs=pl.BlockSpec((tmp, pack * heads), lambda i: (i, 0)),
        compiler_params=pltpu.CompilerParams(
            dimension_semantics=("parallel",),
            vmem_limit_bytes=32 * 1024 * 1024),
    )(qp, kp, rq, rk, sel)


# --------------------------- cRPE aggregation kernel --------------------------

def _crpe_aggregate_kernel(mstart_ref, mcount_ref, qidx_ref, pair_ref, sel_ref,
                           o_ref, *, hd):
    """Scatter-softmax aggregation (normalize AFTER aggregation).

    grid = (n_tiles ["parallel"], max_m_tiles ["arbitrary"])
    mstart/mcount: SMEM (n_tiles,) i32  per-query-tile pair-tile ranges
    qidx:   (1, tm) i32    pair -> query index (padding = n_pad, never matches)
    pair:   (tm, HD+2H) bf16 = [v+Tv | ones | p]
    sel:    (H, HD+H) bf16 head-widening selector (+ identity for the den cols)
    o_ref:  (tn, HD+H) f32 running [numerator | denominator], normalized at the end
    """
    ni = pl.program_id(0)
    mj = pl.program_id(1)
    tn = o_ref.shape[0]
    tm = pair_ref.shape[0]
    heads = sel_ref.shape[0]

    @pl.when(mj == 0)
    def _init():
        o_ref[...] = jnp.zeros_like(o_ref)

    @pl.when(mj < mcount_ref[ni])
    def _accumulate():
        pair = pair_ref[...]                                    # (tm, HD+2H) bf16
        p = pair[:, hd + heads:].astype(jnp.float32)            # (tm, H)
        vals = pair[:, :hd + heads].astype(jnp.float32)         # (tm, HD+H) [v+Tv | 1]
        p_wide = jnp.dot(p, sel_ref[...].astype(jnp.float32),
                         preferred_element_type=jnp.float32)    # (tm, HD+H)
        weighted = (vals * p_wide).astype(jnp.bfloat16)
        rows = jax.lax.broadcasted_iota(jnp.int32, (tn, tm), 0) + ni * tn
        onehot = (rows == qidx_ref[...]).astype(jnp.bfloat16)   # (tn, tm) built once
        # single MXU matmul produces numerator AND denominator columns
        o_ref[...] += jnp.dot(onehot, weighted,
                              preferred_element_type=jnp.float32)

    @pl.when(mj == pl.num_programs(1) - 1)
    def _finalize():
        den = o_ref[:, hd:]                                     # (tn, H)
        den_wide = jnp.dot(den, sel_ref[...].astype(jnp.float32),
                           preferred_element_type=jnp.float32)  # (tn, HD+H)
        inv = pl.reciprocal(den_wide, approx=True)
        # where() before the multiply so empty/padded queries stay exactly 0
        o_ref[...] *= jnp.where(den_wide > 0.0, inv, 0.0)


def crpe_aggregate_pallas(mstart, mcount, qidx_row, pairvals, sel_ext, *,
                          n_pad, tile_n, tile_m, hd, heads, max_m_tiles):
    width = hd + 2 * heads
    n_tiles = n_pad // tile_n

    def m_block(ni, mj, ms_ref, mc_ref):
        last = jnp.maximum(mc_ref[ni] - 1, 0)
        return ms_ref[ni] + jnp.minimum(mj, last)

    qidx_map = lambda ni, mj, ms, mc: (0, m_block(ni, mj, ms, mc))
    pair_map = lambda ni, mj, ms, mc: (m_block(ni, mj, ms, mc), 0)
    sel_map = lambda ni, mj, ms, mc: (0, 0)
    out_map = lambda ni, mj, ms, mc: (ni, 0)

    return pl.pallas_call(
        functools.partial(_crpe_aggregate_kernel, hd=hd),
        out_shape=jax.ShapeDtypeStruct((n_pad, hd + heads), jnp.float32),
        grid_spec=pltpu.PrefetchScalarGridSpec(
            num_scalar_prefetch=2,
            grid=(n_tiles, max_m_tiles),
            in_specs=[pl.BlockSpec((1, tile_m), qidx_map),
                      pl.BlockSpec((tile_m, width), pair_map),
                      pl.BlockSpec((heads, hd + heads), sel_map)],
            out_specs=pl.BlockSpec((tile_n, hd + heads), out_map)),
        compiler_params=pltpu.CompilerParams(
            dimension_semantics=("parallel", "arbitrary"),
            vmem_limit_bytes=32 * 1024 * 1024),
    )(mstart, mcount, qidx_row, pairvals, sel_ext)


def _pair_tile_ranges(qidx_np, n_pad, tile_n, m_pad, tile_m):
    """Host-side per-query-tile pair-tile [start, start+count) (requires sorted qidx)."""
    n_tiles = n_pad // tile_n
    total_m_tiles = m_pad // tile_m
    m = qidx_np.shape[0]
    if m >= 1 and np.all(np.diff(qidx_np) >= 0):
        bounds = np.searchsorted(qidx_np, np.arange(0, n_pad + 1, tile_n))
        start = np.minimum(bounds[:-1] // tile_m, total_m_tiles - 1)
        end = np.minimum((bounds[1:] + tile_m - 1) // tile_m, total_m_tiles)
        count = np.maximum(end - start, 0)
    else:
        # TODO(synk): unsorted qidx falls back to the dense O(N*M) schedule.
        start = np.zeros(n_tiles, np.int64)
        count = np.full(n_tiles, total_m_tiles, np.int64)
    return (start.astype(np.int32), count.astype(np.int32),
            max(1, int(count.max())))


# ------------------------------ CRPEAttention core ---------------------------

def crpe_attention_forward(params, coords, feats, qk, *, heads, head_channels,
                           bins, bin_size, tile_m=1024, tile_n=256):
    n = feats.shape[0]
    hd = heads * head_channels
    qidx = qk[0].astype(jnp.int32)
    kidx = qk[1].astype(jnp.int32)
    m = int(qidx.shape[0])

    # qkv projection (bf16 MXU operands).  Column layout [q | k | v], head-major,
    # matching torch's reshape(-1, 3, heads, head_channels).
    qkv = linear_pallas(feats, params["qkv_w"], params["qkv_b"], cast_bf16=True)
    scale = 1.0 / math.sqrt(head_channels)
    q = qkv[:, :hd] * scale            # scale q once per point (not per pair)
    k = qkv[:, hd:2 * hd]
    v = qkv[:, 2 * hd:]

    # relative xyz table indices (matches torch .int() trunc + clip)
    rel = (coords[qidx] - coords[kidx]) / bin_size + bins / 2.0
    ridx = jnp.clip(rel.astype(jnp.int32), 0, bins - 1)                # (M, 3)

    def table_lookup(t):                                               # -> (M, H*D)
        g = t[0, ridx[:, 0]] + t[1, ridx[:, 1]] + t[2, ridx[:, 2]]
        return g.reshape(m, hd)

    rq = table_lookup(params["Tq"])
    rk_t = table_lookup(params["Tk"])
    rv = table_lookup(params["Tv"])

    qp = q[qidx]
    kp = k[kidx]
    wv = v[kidx] + rv                                                  # (M, HD) f32

    # ---- tiling (pair axis packed lane-dense: `pack` pairs per 128-lane row) ----
    pack = 128 // hd if 128 % hd == 0 else 1
    m_unit = _lcm(8 * pack, 128)        # keeps qidx lane blocks 128-aligned
    tm = _pick_tile(m, m_unit, tile_m)
    m_pad = _round_up(m, tm)
    tn = _pick_tile(n, 8, tile_n)
    n_pad = _round_up(n, tn)

    def pad_rows(a, rows):
        return jnp.pad(a, ((0, rows - a.shape[0]), (0, 0)))

    # ---- pass 1: per-pair logits, lane-dense packed ----
    qp_p = pad_rows(qp, m_pad).reshape(m_pad // pack, pack * hd)
    kp_p = pad_rows(kp, m_pad).reshape(m_pad // pack, pack * hd)
    rq_p = pad_rows(rq, m_pad).astype(jnp.bfloat16).reshape(m_pad // pack, pack * hd)
    rk_p = pad_rows(rk_t, m_pad).astype(jnp.bfloat16).reshape(m_pad // pack, pack * hd)
    sel_pack = _packed_head_selector(pack, heads, head_channels)

    logits = crpe_logits_pallas(qp_p, kp_p, rq_p, rk_p, sel_pack,
                                heads=heads, pack=pack, tile_m=tm)
    logits = logits.reshape(m_pad, heads)[:m]                          # (M, H) f32

    # exact per-segment-max stabilized softmax numerator, computed in the wrapper
    # (fuses with the seg_max gather; one thin stream fewer for the kernel).
    seg_max = jax.ops.segment_max(logits, qidx, num_segments=n)        # (N, H)
    p = jnp.exp(logits - seg_max[qidx])                                # (M, H) f32

    # ---- pass 2: aggregation.  Single bf16 pair stream [v+Tv | ones | p]. ----
    ones = jnp.ones((m, heads), jnp.float32)
    pairvals = jnp.concatenate([wv, ones, p], axis=-1).astype(jnp.bfloat16)
    pairvals = pad_rows(pairvals, m_pad)                               # (M_pad, HD+2H)
    # padded qidx = n_pad never matches any query row in [0, n_pad)
    qidx_row = jnp.pad(qidx, (0, m_pad - m),
                       constant_values=n_pad).reshape(1, m_pad)
    sel_ext = _ext_head_selector(heads, head_channels)

    # sorted-qidx pair-tile ranges -> each pair tile streamed to ~one query tile
    mstart_np, mcount_np, max_m_tiles = _pair_tile_ranges(
        np.asarray(qidx), n_pad, tn, m_pad, tm)

    agg = crpe_aggregate_pallas(
        jnp.asarray(mstart_np), jnp.asarray(mcount_np),
        qidx_row, pairvals, sel_ext,
        n_pad=n_pad, tile_n=tn, tile_m=tm, hd=hd, heads=heads,
        max_m_tiles=max_m_tiles)                                       # (N_pad, HD+H)
    return agg[:n, :hd]


# --------------------------- DenseOrSparse module -----------------------------

def dense_or_sparse_stratified_crpe_attention(params, coords, feats, qk_dense,
                                               qk_sparse, *, heads, head_channels,
                                               window_size, crpe_bins):
    heads_dense = math.ceil(heads / 2)
    heads_sparse = heads // 2
    bin_dense = 2.0 * window_size / crpe_bins
    bin_sparse = 2.0 * (2.0 * window_size) / crpe_bins

    agg_d = crpe_attention_forward(params["dense"], coords, feats, qk_dense,
                                   heads=heads_dense, head_channels=head_channels,
                                   bins=crpe_bins, bin_size=bin_dense)
    agg_s = crpe_attention_forward(params["sparse"], coords, feats, qk_sparse,
                                   heads=heads_sparse, head_channels=head_channels,
                                   bins=crpe_bins, bin_size=bin_sparse)
    agg = jnp.concatenate([agg_d, agg_s], axis=-1)                     # (N, heads*D)
    return linear_pallas(agg, params["proj_w"], params["proj_b"], cast_bf16=True)


# -------------------- pair-index construction (numpy glue) -------------------
# TODO(synk): gridsample / farthest_point_sampling / stratifiedQueryKeyPairs are
# custom CUDA ops in the original repo; reproduced with deterministic numpy
# equivalents (pair ORDER within a query may differ, the pair SETS match the
# documented dense / sparse window semantics, qidx is emitted sorted).

def _gridsample(coords, voxel_size, start):
    v = np.floor((coords - start) / voxel_size).astype(np.int64)
    _, inv = np.unique(v, axis=0, return_inverse=True)
    return inv


def _farthest_point_sampling(coords, ratio):
    n = coords.shape[0]
    m = max(1, int(math.ceil(n * ratio)))
    sel = np.zeros(m, dtype=np.int64)
    dist = np.full(n, np.inf)
    cur = 0
    for i in range(m):
        sel[i] = cur
        d = np.sum((coords - coords[cur]) ** 2, axis=1)
        dist = np.minimum(dist, d)
        cur = int(np.argmax(dist))
    return sel


def compute_qk_pair_indices(coords_np, window_size, shifted, downsample_ratio):
    """Returns (dense_pairs [2, Md], sparse_pairs [2, Ms]) with sorted qidx."""
    large_ws = 2.0 * window_size
    small = _gridsample(coords_np, window_size,
                        -window_size / 2 if shifted else 0.0)
    large = _gridsample(coords_np, large_ws, -large_ws / 2 if shifted else 0.0)
    down = _farthest_point_sampling(coords_np, downsample_ratio)
    n = coords_np.shape[0]
    is_down = np.zeros(n, dtype=bool)
    is_down[down] = True
    dq, dk, sq, sk = [], [], [], []
    for i in range(n):
        dkeys = np.nonzero(small == small[i])[0]
        dq.append(np.full(dkeys.shape, i, np.int64))
        dk.append(dkeys)
        skeys = np.nonzero((large == large[i]) & is_down)[0]
        sq.append(np.full(skeys.shape, i, np.int64))
        sk.append(skeys)
    dense = np.stack([np.concatenate(dq), np.concatenate(dk)], axis=0)
    sparse = np.stack([np.concatenate(sq), np.concatenate(sk)], axis=0)
    return dense, sparse


# ----------------------------- pure-JAX reference ----------------------------

def _crpe_attention_reference(params, coords, feats, qk, *, heads, head_channels,
                              bins, bin_size):
    h, d = heads, head_channels
    n = feats.shape[0]
    qidx, kidx = qk[0], qk[1]

    qkv = feats @ params["qkv_w"] + params["qkv_b"]
    qkv = qkv.reshape(n, 3, h, d)
    q, k, v = qkv[:, 0] / math.sqrt(d), qkv[:, 1], qkv[:, 2]

    rel = (coords[qidx] - coords[kidx]) / bin_size + bins / 2.0
    ridx = jnp.clip(rel.astype(jnp.int32), 0, bins - 1)
    tq, tk, tv = params["Tq"], params["Tk"], params["Tv"]
    rq = tq[0, ridx[:, 0]] + tq[1, ridx[:, 1]] + tq[2, ridx[:, 2]]
    rk = tk[0, ridx[:, 0]] + tk[1, ridx[:, 1]] + tk[2, ridx[:, 2]]
    rv = tv[0, ridx[:, 0]] + tv[1, ridx[:, 1]] + tv[2, ridx[:, 2]]

    qp, kp, vp = q[qidx], k[kidx], v[kidx]
    logits = jnp.sum(qp * kp + qp * rq + kp * rk, axis=-1)             # (M, H)
    seg_max = jax.ops.segment_max(logits, qidx, num_segments=n)
    p = jnp.exp(logits - seg_max[qidx])
    denom = jax.ops.segment_sum(p, qidx, num_segments=n)
    attn = p / denom[qidx]
    agg = jax.ops.segment_sum(attn[:, :, None] * (vp + rv), qidx, num_segments=n)
    return agg.reshape(n, h * d)


def reference_forward(params, coords, feats, qk_dense, qk_sparse, *, heads,
                      head_channels, window_size, crpe_bins):
    heads_dense = math.ceil(heads / 2)
    heads_sparse = heads // 2
    bin_dense = 2.0 * window_size / crpe_bins
    bin_sparse = 2.0 * (2.0 * window_size) / crpe_bins
    agg_d = _crpe_attention_reference(params["dense"], coords, feats, qk_dense,
                                      heads=heads_dense, head_channels=head_channels,
                                      bins=crpe_bins, bin_size=bin_dense)
    agg_s = _crpe_attention_reference(params["sparse"], coords, feats, qk_sparse,
                                      heads=heads_sparse, head_channels=head_channels,
                                      bins=crpe_bins, bin_size=bin_sparse)
    agg = jnp.concatenate([agg_d, agg_s], axis=-1)
    return agg @ params["proj_w"] + params["proj_b"]


# -------------------------------- param init ---------------------------------

def init_params(key, in_channels, out_channels, heads, head_channels, bins):
    heads_dense = math.ceil(heads / 2)
    heads_sparse = heads // 2
    k_dense, k_sparse, k_proj = jax.random.split(key, 3)

    def trunc(kk, shape):
        return 0.02 * jax.random.truncated_normal(kk, -2.0, 2.0, shape,
                                                  dtype=jnp.float32)

    def branch(kb, h):
        ks = jax.random.split(kb, 5)
        bound = 1.0 / math.sqrt(in_channels)
        w = jax.random.uniform(ks[0], (in_channels, 3 * h * head_channels),
                               jnp.float32, -bound, bound)
        b = jax.random.uniform(ks[1], (3 * h * head_channels,), jnp.float32,
                               -bound, bound)
        return dict(qkv_w=w, qkv_b=b,
                    Tq=trunc(ks[2], (3, bins, h, head_channels)),
                    Tk=trunc(ks[3], (3, bins, h, head_channels)),
                    Tv=trunc(ks[4], (3, bins, h, head_channels)))

    fan_in = heads * head_channels
    bound = 1.0 / math.sqrt(fan_in)
    kw, kb = jax.random.split(k_proj, 2)
    proj_w = jax.random.uniform(kw, (fan_in, out_channels), jnp.float32,
                                -bound, bound)
    proj_b = jax.random.uniform(kb, (out_channels,), jnp.float32, -bound, bound)
    return dict(dense=branch(k_dense, heads_dense),
                sparse=branch(k_sparse, heads_sparse),
                proj_w=proj_w, proj_b=proj_b)


# ------------------------------------ main ------------------------------------

if __name__ == "__main__":
    # module hyper-parameters
    in_channels, out_channels, heads = 16, 32, 4
    window_size, shifted, downsample_ratio, crpe_bins = 0.25, False, 0.5, 8
    head_channels = math.ceil(out_channels / heads)
    n_points = 64

    key = jax.random.PRNGKey(0)
    k_coords, k_feats, k_params = jax.random.split(key, 3)
    coords = jax.random.uniform(k_coords, (n_points, 3), jnp.float32)
    feats = jax.random.normal(k_feats, (n_points, in_channels), jnp.float32)
    params = init_params(k_params, in_channels, out_channels, heads,
                         head_channels, crpe_bins)

    dense_np, sparse_np = compute_qk_pair_indices(np.asarray(coords), window_size,
                                                  shifted, downsample_ratio)
    # precondition of the one-hot scatter path: valid query indices
    assert int(dense_np[0].max()) < n_points and int(sparse_np[0].max()) < n_points
    qk_dense = jnp.asarray(dense_np, dtype=jnp.int32)
    qk_sparse = jnp.asarray(sparse_np, dtype=jnp.int32)

    out = dense_or_sparse_stratified_crpe_attention(
        params, coords, feats, qk_dense, qk_sparse, heads=heads,
        head_channels=head_channels, window_size=window_size,
        crpe_bins=crpe_bins)
    out = jax.block_until_ready(out)

    ref = reference_forward(params, coords, feats, qk_dense, qk_sparse,
                            heads=heads, head_channels=head_channels,
                            window_size=window_size, crpe_bins=crpe_bins)
    # bf16 MXU operands (qkv / logits terms / p / values / projection) with f32
    # accumulation + approx reciprocal => slightly looser than pure-f32 tolerance
    np.testing.assert_allclose(np.asarray(out), np.asarray(ref),
                               rtol=2e-2, atol=2e-2)
    print("KERNEL_OK")
</pallas_src>

<mosaic_0001>
module attributes {stable_mosaic.version = 11 : i64} {
  func.func @_linear_kernel(%arg0: i32, %arg1: memref<32x16xbf16, #tpu.memory_space<vmem>>, %arg2: memref<16x48xbf16, #tpu.memory_space<vmem>>, %arg3: memref<1x48xf32, #tpu.memory_space<vmem>>, %arg4: memref<32x48xf32, #tpu.memory_space<vmem>>) attributes {dimension_semantics = [#tpu.dimension_semantics<parallel>], iteration_bounds = array<i64: 2>, scalar_prefetch = 0 : i64, scratch_operands = 0 : i64, tpu.core_type = #tpu.core_type<tc>, window_params = [{transform_indices = @transform_0, window_bounds = array<i64: 32, 16>}, {pipeline_mode = #tpu.pipeline_mode<synchronous>, transform_indices = @transform_1, window_bounds = array<i64: 16, 48>}, {pipeline_mode = #tpu.pipeline_mode<synchronous>, transform_indices = @transform_2, window_bounds = array<i64: 1, 48>}, {transform_indices = @transform_3, window_bounds = array<i64: 32, 48>}]} {
    %c0 = arith.constant 0 : index
    %c0_0 = arith.constant 0 : index
    %0 = vector.load %arg1[%c0, %c0_0] : memref<32x16xbf16, #tpu.memory_space<vmem>>, vector<32x16xbf16>
    %c0_1 = arith.constant 0 : index
    %c0_2 = arith.constant 0 : index
    %1 = vector.load %arg2[%c0_1, %c0_2] : memref<16x48xbf16, #tpu.memory_space<vmem>>, vector<16x48xbf16>
    %cst = arith.constant dense<0.000000e+00> : vector<32x48xf32>
    %2 = tpu.matmul %0, %1, %cst {dimension_numbers = #tpu.dot_dimension_numbers<[1], [0], [0], [1], [0, 0, 1, 1], [], []>} : vector<32x16xbf16>, vector<16x48xbf16>, vector<32x48xf32> -> vector<32x48xf32>
    %c0_3 = arith.constant 0 : index
    %c0_4 = arith.constant 0 : index
    %3 = vector.load %arg3[%c0_3, %c0_4] : memref<1x48xf32, #tpu.memory_space<vmem>>, vector<1x48xf32>
    %4 = vector.broadcast %3 : vector<1x48xf32> to vector<32x48xf32>
    %5 = arith.addf %2, %4 : vector<32x48xf32>
    %c0_5 = arith.constant 0 : index
    %c0_6 = arith.constant 0 : index
    %6 = vector.load %arg4[%c0_5, %c0_6] : memref<32x48xf32, #tpu.memory_space<vmem>>, vector<32x48xf32>
    tpu.vector_store %arg4[%c0_5, %c0_6], %5 {strides = array<i32>} : memref<32x48xf32, #tpu.memory_space<vmem>>, vector<32x48xf32>,
    return
  }
  func.func @transform_0(%arg0: i32) -> (i32, i32) {
    %c0_i32 = arith.constant 0 : i32
    %c0_i32_0 = arith.constant 0 : i32
    return %arg0, %c0_i32 : i32, i32
  }
  func.func @transform_1(%arg0: i32) -> (i32, i32) {
    %c0_i32 = arith.constant 0 : i32
    %c0_i32_0 = arith.constant 0 : i32
    %c0_i32_1 = arith.constant 0 : i32
    return %c0_i32, %c0_i32_0 : i32, i32
  }
  func.func @transform_2(%arg0: i32) -> (i32, i32) {
    %c0_i32 = arith.constant 0 : i32
    %c0_i32_0 = arith.constant 0 : i32
    %c0_i32_1 = arith.constant 0 : i32
    return %c0_i32, %c0_i32_0 : i32, i32
  }
  func.func @transform_3(%arg0: i32) -> (i32, i32) {
    %c0_i32 = arith.constant 0 : i32
    %c0_i32_0 = arith.constant 0 : i32
    return %arg0, %c0_i32 : i32, i32
  }
}

</mosaic_0001>

<bundles_post_ra>
// kernel: tpu_custom_call.1
= control target key start
LH: loop header
LB: loop body
LE: loop exit
PB: predicated region body
PF: predicated region fallthrough
CT: control target
= control target key end

     0   :  { %s354_s12 = smov 0   ;;  %s377_s0 = inlined_call_operand.vmem [shape: bf16[64,16], index: 0, kind: input, shape index: {}]   ;;  %s378_s1 = inlined_call_operand.vmem [shape: bf16[16,48], index: 1, kind: input, shape index: {}]   ;;  %s379_s2 = inlined_call_operand.vmem [shape: f32[1,48], index: 2, kind: input, shape index: {}]   ;;  %s380_s3 = inlined_call_operand.vmem [shape: f32[64,48], index: 3, kind: output, shape index: {}]  }
   0x1 LB: > { %s288_s13 = sadd.s32 4294967295, %s332_s12   ;;  %p292_p0 = scmp.ge.s32.totalorder %s332_s12, 1  ;;  %s332_s12 = sphi %s354_s12, %s13_s12  }
   0x2   : > { %p138_p1 = scmp.lt.s32.totalorder %s332_s12, 3 }
   0x4   : > { %p139_p2 = pnand %p292_p0, %p138_p1 }
   0x5   : > { %s293_s16 = sshll.u32 (!%p139_p2), %s288_s13, 2 }
   0x6   : > { %142 = sbr.rel (%p139_p2) target bundleno = 153 (0x99), region = 32  ;;  %p163_p3 = scmp.lt.s32.totalorder (!%p139_p2), %s293_s16, 7 }
   0xb   : > { %v315_v0 = vld [vmem:[%s378_s1] sm:$0xff]  ;;  %s382_s16 = smov (!%p163_p3, %s293_s16), 7  ;;  %vm201_vm0 = vcmask 130048   ;;  %vm227_vm1 = vcmask 392192  }
   0xc   : > { %215 = vmatpush.bf16.msra.mxu0 %v315_v0  ;;  %316 = vmatpush.bf16.msra.mxu1 %v315_v0  ;;  %s294_s17 = sshll.u32 %s382_s16, 2  ;;  %s296_s21 = sshll.u32 %s382_s16, 3  ;;  %v325_v3 = vld [vmem:[%s379_s2] ss:$0 sm:$0xff] }
   0xd   : > { %s166_s20 = scalar_lea.vmem %s377_s0, %s294_s17  ;;  %s172_s26 = scalar_lea.vmem %s380_s3, %s296_s21 }
   0xe   : > { %v313_v1 = vld [vmem:[%s166_s20] sm:$0xff]  ;;  %v314_v2 = vld [vmem:[%s166_s20 + $0x8] sm:$0xff] }
   0xf   : > { %309 = vmatmul.msk.bf16.vlgmr.msra.gmra.mxu0 %vm201_vm0, %v313_v1  ;;  %310 = vmatmul.msk.bf16.vlgmr.msra.gmra.mxu1 %vm201_vm0, %v314_v2 }
  0x8c   : > { %v217_v4 = vpop.f32.mrf.mxu0  ;;  %v222_v5 = vpop.f32.mrf.mxu1 }
  0x8d   : > { %v218_v6 = vadd.f32 %v325_v3, %v217_v4  ;;  %v223_v10 = vadd.f32 %v325_v3, %v222_v5 }
  0x8f   : > { %228 = vst.msk [vmem:[%s172_s26] sm:$0xff] %vm227_vm1, %v218_v6 }
  0x90   : > { %230 = vst.msk [vmem:[%s172_s26 + $0x10] sm:$0xff] %vm227_vm1, %v223_v10 }
  0x94   : > { %v219_v7 = vpop.f32.mrf.mxu0  ;;  %v224_v8 = vpop.f32.mrf.mxu1 }
  0x95   : > { %v220_v9 = vadd.f32 %v325_v3, %v219_v7  ;;  %v225_v11 = vadd.f32 %v325_v3, %v224_v8 }
  0x97   : > { %229 = vst.msk [vmem:[%s172_s26 + $0x8] sm:$0xff] %vm227_vm1, %v220_v9 }
  0x98   : > { %231 = vst.msk [vmem:[%s172_s26 + $0x18] sm:$0xff] %vm227_vm1, %v225_v11 }
  0x99 PF: > { %s13_s12 = sadd.s32 1, %s332_s12  }
  0x9a   : > { %p10_p4 = scmp.ge.s32.totalorder %s13_s12, 4  }
  0x9c   :  { %12 = sbr.rel (!%p10_p4) target bundleno = 1 (0x1), region = 62 }

</bundles_post_ra>
